<compile_context>
chip_gen: v7x
topology: tpu7x:2x2x1
jax: 0.10.0
libtpu: 0.0.40
codegen_flags: <defaults>
</compile_context>

<pallas_src>
import functools
import math

import jax
import jax.numpy as jnp
from jax.experimental import pallas as pl
from jax.experimental.pallas import tpu as pltpu


def _round_up(x, m):
    return ((x + m - 1) // m) * m


def _pick_tile(dim, candidates):
    """Largest candidate that evenly divides `dim`; falls back to the full dim."""
    for c in candidates:
        if dim >= c and dim % c == 0:
            return c
    return dim


def _block_spec(shape, index_map, *, single_buffer=False):
    """BlockSpec; single-buffered when the block is grid-invariant (resident)."""
    if single_buffer and hasattr(pl, "Buffered"):
        try:
            return pl.BlockSpec(shape, index_map, pipeline_mode=pl.Buffered(1))
        except TypeError:  # pipeline_mode kwarg unavailable -> default buffering
            pass
    return pl.BlockSpec(shape, index_map)


def _vmem_limit(bytes_estimate):
    return int(min(max(int(bytes_estimate * 1.5) + (4 << 20), 32 << 20), 96 << 20))


# --------------------------- kernels ---------------------------

def _merge_fused_kernel(x_ref, w_ref, b_ref, o_ref, acc_ref, *, negative_slope):
    """grid = (m, n, k): acc += x_tile @ w_tile; bias + LeakyReLU at last k."""
    k = pl.program_id(2)

    @pl.when(k == 0)
    def _():
        acc_ref[...] = jnp.zeros_like(acc_ref)

    acc_ref[...] += jnp.dot(x_ref[...], w_ref[...],
                            preferred_element_type=jnp.float32)

    @pl.when(k == pl.num_programs(2) - 1)
    def _():
        h = acc_ref[...] + b_ref[...]
        o_ref[...] = jnp.where(h >= 0, h,
                               jnp.float32(negative_slope) * h).astype(o_ref.dtype)


def _merge_split_kernel(x1_ref, x2_ref, wa_ref, wb_ref, b_ref, o_ref,
                        *, negative_slope):
    """grid = (m, n): h = x1 @ Wa + x2 @ Wb + b (no lane-dim concat)."""
    h = jnp.dot(x1_ref[...], wa_ref[...], preferred_element_type=jnp.float32)
    h = h + jnp.dot(x2_ref[...], wb_ref[...], preferred_element_type=jnp.float32)
    h = h + b_ref[...]
    o_ref[...] = jnp.where(h >= 0, h,
                           jnp.float32(negative_slope) * h).astype(o_ref.dtype)


# --------------------------- wrapper ---------------------------

def merge_layer_forward(x1, x2, w, b, *, block_b=256, block_n=512, block_k=512,
                        negative_slope=0.01, compute_dtype=jnp.bfloat16):
    """MergeLayer forward.

    x1: [B, dim1], x2: [B, dim2]
    w : [dim1+dim2, dim3]   (== PyTorch fc1.weight.T, stored [in, out])
    b : [dim3]
    returns f32 [B, dim3]
    """
    B, d1 = x1.shape
    B2, d2 = x2.shape
    assert B == B2
    d_in, d3 = w.shape
    assert d_in == d1 + d2

    # Pad the output/lane dim to a multiple of 128 -> unmasked vst stores.
    d3p = _round_up(d3, 128)
    if d3p != d3:
        w = jnp.pad(w, ((0, 0), (0, d3p - d3)))
        b = jnp.pad(b, (0, d3p - d3))
    b2d = b.reshape(1, d3p).astype(jnp.float32)

    tile_b = min(block_b, _round_up(B, 8))
    m_tiles = pl.cdiv(B, tile_b)           # ragged edge block handled by masked writes
    tn = _pick_tile(d3p, (block_n, 256, 128))
    n_tiles = d3p // tn

    itemsize = jnp.dtype(compute_dtype).itemsize
    out_bytes = 4 * B * d3p
    flops = 2 * B * d_in * d3p

    # Split the matmul only when each half fills the MXU contraction cleanly.
    use_split = (d1 % 128 == 0) and (d2 % 128 == 0)

    if use_split:
        x1c = x1.astype(compute_dtype)
        x2c = x2.astype(compute_dtype)
        wa = w[:d1].astype(compute_dtype)
        wb = w[d1:].astype(compute_dtype)

        w_resident = (n_tiles == 1)
        vmem = 2 * tile_b * (d1 + d2) * itemsize            # x1/x2 double-buffered
        vmem += (1 if w_resident else 2) * (d1 + d2) * tn * itemsize
        vmem += (1 if w_resident else 2) * tn * 4           # bias
        vmem += 2 * tile_b * tn * 4                         # out double-buffered
        # TODO(synk): for very large d_in on v7x (64 MiB VMEM) add a K grid axis with
        # an accumulator here as well; the fused path below already does.

        cost = pl.CostEstimate(
            flops=flops, transcendentals=0,
            bytes_accessed=itemsize * (B * d_in + d_in * d3p) + 4 * d3p + out_bytes)

        kernel = functools.partial(_merge_split_kernel,
                                   negative_slope=negative_slope)
        out = pl.pallas_call(
            kernel,
            out_shape=jax.ShapeDtypeStruct((B, d3p), jnp.float32),
            grid=(m_tiles, n_tiles),
            in_specs=[
                pl.BlockSpec((tile_b, d1), lambda i, j: (i, 0)),
                pl.BlockSpec((tile_b, d2), lambda i, j: (i, 0)),
                _block_spec((d1, tn), lambda i, j: (0, j), single_buffer=w_resident),
                _block_spec((d2, tn), lambda i, j: (0, j), single_buffer=w_resident),
                _block_spec((1, tn), lambda i, j: (0, j), single_buffer=w_resident),
            ],
            out_specs=pl.BlockSpec((tile_b, tn), lambda i, j: (i, j)),
            compiler_params=pltpu.CompilerParams(
                dimension_semantics=("parallel", "parallel"),
                vmem_limit_bytes=_vmem_limit(vmem)),
            cost_estimate=cost,
        )(x1c, x2c, wa, wb, b2d)
    else:
        # Small / unaligned d1, d2: one fused matmul (concat once in the wrapper,
        # fused by XLA with the bf16 cast), with K tiling + f32 accumulator.
        x = jnp.concatenate([x1, x2], axis=-1).astype(compute_dtype)
        wc = w.astype(compute_dtype)
        tk = _pick_tile(d_in, (block_k, 256, 128))
        k_tiles = d_in // tk

        w_resident = (n_tiles == 1 and k_tiles == 1)
        bias_resident = (n_tiles == 1)
        vmem = 2 * tile_b * tk * itemsize                    # x double-buffered
        vmem += (1 if w_resident else 2) * tk * tn * itemsize
        vmem += (1 if bias_resident else 2) * tn * 4
        vmem += 2 * tile_b * tn * 4                          # out double-buffered
        vmem += tile_b * tn * 4                              # f32 accumulator scratch

        cost = pl.CostEstimate(
            flops=flops, transcendentals=0,
            bytes_accessed=itemsize * (B * d_in + d_in * d3p) + 4 * d3p + out_bytes)

        kernel = functools.partial(_merge_fused_kernel,
                                   negative_slope=negative_slope)
        out = pl.pallas_call(
            kernel,
            out_shape=jax.ShapeDtypeStruct((B, d3p), jnp.float32),
            grid=(m_tiles, n_tiles, k_tiles),
            in_specs=[
                pl.BlockSpec((tile_b, tk), lambda i, j, k: (i, k)),
                _block_spec((tk, tn), lambda i, j, k: (k, j),
                            single_buffer=w_resident),
                _block_spec((1, tn), lambda i, j, k: (0, j),
                            single_buffer=bias_resident),
            ],
            out_specs=pl.BlockSpec((tile_b, tn), lambda i, j, k: (i, j)),
            scratch_shapes=[pltpu.VMEM((tile_b, tn), jnp.float32)],
            compiler_params=pltpu.CompilerParams(
                dimension_semantics=("parallel", "parallel", "arbitrary"),
                vmem_limit_bytes=_vmem_limit(vmem)),
            cost_estimate=cost,
        )(x, wc, b2d)

    return out[:, :d3] if d3p != d3 else out


# --------------------------- demo / check ---------------------------

if __name__ == "__main__":
    def reference(x1, x2, w, b, slope=0.01):
        cat = jnp.concatenate([x1, x2], axis=-1)
        h = cat @ w + b
        return jnp.where(h >= 0, h, slope * h)

    # Case 1: small, lane-unaligned dims (fused-matmul path, padded d3, bf16 MXU).
    key = jax.random.PRNGKey(0)
    B, dim1, dim2, dim3 = 16, 32, 32, 32
    k1, k2, kw, kb = jax.random.split(key, 4)
    x1 = jax.random.normal(k1, (B, dim1), jnp.float32)
    x2 = jax.random.normal(k2, (B, dim2), jnp.float32)
    std = math.sqrt(2.0 / (dim1 + dim2 + dim3))      # xavier_normal_, stored as [in, out]
    w = jax.random.normal(kw, (dim1 + dim2, dim3), jnp.float32) * std
    b = jax.random.normal(kb, (dim3,), jnp.float32) * 0.02

    out = merge_layer_forward(x1, x2, w, b)
    jax.block_until_ready(out)
    ref = reference(x1, x2, w, b)
    assert out.shape == (B, dim3)
    # bf16 MXU operands with f32 accumulation -> loose tolerance.
    assert jnp.allclose(out, ref, atol=5e-2, rtol=5e-2), \
        float(jnp.max(jnp.abs(out - ref)))

    # Case 2: ragged batch + odd dims, f32 compute (no host pad; edge writes masked).
    kq = jax.random.split(jax.random.PRNGKey(1), 4)
    B2_, dA, dB_, dC = 10, 24, 40, 48
    y1 = jax.random.normal(kq[0], (B2_, dA), jnp.float32)
    y2 = jax.random.normal(kq[1], (B2_, dB_), jnp.float32)
    w2 = jax.random.normal(kq[2], (dA + dB_, dC), jnp.float32) * 0.1
    b2 = jax.random.normal(kq[3], (dC,), jnp.float32) * 0.02
    out2 = merge_layer_forward(y1, y2, w2, b2, compute_dtype=jnp.float32)
    jax.block_until_ready(out2)
    ref2 = reference(y1, y2, w2, b2)
    assert out2.shape == (B2_, dC)
    assert jnp.allclose(out2, ref2, atol=1e-4, rtol=1e-4), \
        float(jnp.max(jnp.abs(out2 - ref2)))

    print("KERNEL_OK")
</pallas_src>

<mosaic_0001>
module attributes {stable_mosaic.version = 11 : i64} {
  func.func @_merge_fused_kernel(%arg0: i32, %arg1: i32, %arg2: i32, %arg3: memref<16x64xbf16, #tpu.memory_space<vmem>>, %arg4: memref<64x128xbf16, #tpu.memory_space<vmem>>, %arg5: memref<1x128xf32, #tpu.memory_space<vmem>>, %arg6: memref<16x128xf32, #tpu.memory_space<vmem>>, %arg7: memref<16x128xf32, #tpu.memory_space<vmem>>) attributes {dimension_semantics = [#tpu.dimension_semantics<parallel>, #tpu.dimension_semantics<parallel>, #tpu.dimension_semantics<arbitrary>], iteration_bounds = array<i64: 1, 1, 1>, scalar_prefetch = 0 : i64, scratch_operands = 1 : i64, tpu.core_type = #tpu.core_type<tc>, window_params = [{transform_indices = @transform_0, window_bounds = array<i64: 16, 64>}, {pipeline_mode = #tpu.pipeline_mode<synchronous>, transform_indices = @transform_1, window_bounds = array<i64: 64, 128>}, {pipeline_mode = #tpu.pipeline_mode<synchronous>, transform_indices = @transform_2, window_bounds = array<i64: 1, 128>}, {transform_indices = @transform_3, window_bounds = array<i64: 16, 128>}]} {
    %c0_i32 = arith.constant 0 : i32
    %0 = arith.cmpi eq, %arg2, %c0_i32 : i32
    %1 = arith.extui %0 : i1 to i32
    %c0_i32_0 = arith.constant 0 : i32
    %2 = arith.cmpi ne, %1, %c0_i32_0 : i32
    scf.if %2 {
      %cst_10 = arith.constant 0.000000e+00 : f32
      %12 = vector.broadcast %cst_10 : f32 to vector<16x128xf32>
      %c0_11 = arith.constant 0 : index
      %c0_12 = arith.constant 0 : index
      %13 = vector.load %arg7[%c0_11, %c0_12] : memref<16x128xf32, #tpu.memory_space<vmem>>, vector<16x128xf32>
      tpu.vector_store %arg7[%c0_11, %c0_12], %12 {strides = array<i32>} : memref<16x128xf32, #tpu.memory_space<vmem>>, vector<16x128xf32>,
    } else {
    }
    %c0 = arith.constant 0 : index
    %c0_1 = arith.constant 0 : index
    %3 = vector.load %arg7[%c0, %c0_1] : memref<16x128xf32, #tpu.memory_space<vmem>>, vector<16x128xf32>
    %c0_2 = arith.constant 0 : index
    %c0_3 = arith.constant 0 : index
    %4 = vector.load %arg3[%c0_2, %c0_3] : memref<16x64xbf16, #tpu.memory_space<vmem>>, vector<16x64xbf16>
    %c0_4 = arith.constant 0 : index
    %c0_5 = arith.constant 0 : index
    %5 = vector.load %arg4[%c0_4, %c0_5] : memref<64x128xbf16, #tpu.memory_space<vmem>>, vector<64x128xbf16>
    %cst = arith.constant dense<0.000000e+00> : vector<16x128xf32>
    %6 = tpu.matmul %4, %5, %cst {dimension_numbers = #tpu.dot_dimension_numbers<[1], [0], [0], [1], [0, 0, 1, 1], [], []>} : vector<16x64xbf16>, vector<64x128xbf16>, vector<16x128xf32> -> vector<16x128xf32>
    %7 = arith.addf %3, %6 : vector<16x128xf32>
    %c0_6 = arith.constant 0 : index
    %c0_7 = arith.constant 0 : index
    %8 = vector.load %arg7[%c0_6, %c0_7] : memref<16x128xf32, #tpu.memory_space<vmem>>, vector<16x128xf32>
    tpu.vector_store %arg7[%c0_6, %c0_7], %7 {strides = array<i32>} : memref<16x128xf32, #tpu.memory_space<vmem>>, vector<16x128xf32>,
    %c0_i32_8 = arith.constant 0 : i32
    %9 = arith.cmpi eq, %arg2, %c0_i32_8 : i32
    %10 = arith.extui %9 : i1 to i32
    %c0_i32_9 = arith.constant 0 : i32
    %11 = arith.cmpi ne, %10, %c0_i32_9 : i32
    scf.if %11 {
      %c0_10 = arith.constant 0 : index
      %c0_11 = arith.constant 0 : index
      %12 = vector.load %arg7[%c0_10, %c0_11] : memref<16x128xf32, #tpu.memory_space<vmem>>, vector<16x128xf32>
      %c0_12 = arith.constant 0 : index
      %c0_13 = arith.constant 0 : index
      %13 = vector.load %arg5[%c0_12, %c0_13] : memref<1x128xf32, #tpu.memory_space<vmem>>, vector<1x128xf32>
      %14 = vector.broadcast %13 : vector<1x128xf32> to vector<16x128xf32>
      %15 = arith.addf %12, %14 : vector<16x128xf32>
      %cst_14 = arith.constant 0.000000e+00 : f32
      %16 = vector.broadcast %cst_14 : f32 to vector<16x128xf32>
      %17 = arith.cmpf oge, %15, %16 : vector<16x128xf32>
      %cst_15 = arith.constant 0.00999999977 : f32
      %18 = vector.broadcast %cst_15 : f32 to vector<16x128xf32>
      %19 = arith.mulf %18, %15 : vector<16x128xf32>
      %20 = arith.select %17, %15, %19 : vector<16x128xi1>, vector<16x128xf32>
      %c0_16 = arith.constant 0 : index
      %c0_17 = arith.constant 0 : index
      %21 = vector.load %arg6[%c0_16, %c0_17] : memref<16x128xf32, #tpu.memory_space<vmem>>, vector<16x128xf32>
      tpu.vector_store %arg6[%c0_16, %c0_17], %20 {strides = array<i32>} : memref<16x128xf32, #tpu.memory_space<vmem>>, vector<16x128xf32>,
    } else {
    }
    return
  }
  func.func @transform_0(%arg0: i32, %arg1: i32, %arg2: i32) -> (i32, i32) {
    %c0_i32 = arith.constant 0 : i32
    return %arg0, %arg2 : i32, i32
  }
  func.func @transform_1(%arg0: i32, %arg1: i32, %arg2: i32) -> (i32, i32) {
    %c0_i32 = arith.constant 0 : i32
    return %arg2, %arg1 : i32, i32
  }
  func.func @transform_2(%arg0: i32, %arg1: i32, %arg2: i32) -> (i32, i32) {
    %c0_i32 = arith.constant 0 : i32
    %c0_i32_0 = arith.constant 0 : i32
    return %c0_i32, %arg1 : i32, i32
  }
  func.func @transform_3(%arg0: i32, %arg1: i32, %arg2: i32) -> (i32, i32) {
    %c0_i32 = arith.constant 0 : i32
    return %arg0, %arg1 : i32, i32
  }
}

</mosaic_0001>

<bundles_post_ra>
// kernel: tpu_custom_call.1
= control target key start
LH: loop header
LB: loop body
LE: loop exit
PB: predicated region body
PF: predicated region fallthrough
CT: control target
= control target key end

     0   :  { %8 = vsyncpa [#allocation4], 0  ;;  %s358_s0 = inlined_call_operand.hbm [shape: bf16[16,64], index: 0, kind: input, shape index: {}]   ;;  %s359_s1 = inlined_call_operand.hbm [shape: bf16[64,128], index: 1, kind: input, shape index: {}]   ;;  %s360_s2 = inlined_call_operand.vmem [shape: f32[1,128], index: 2, kind: input, shape index: {}]   ;;  %s361_s3 = inlined_call_operand.hbm [shape: f32[16,128], index: 3, kind: output, shape index: {}]  }
   0x1   :  { %9 = vsyncpa [#allocation7], 0 }
   0x2   :  { %10 = vsyncpa [#allocation5], 0  ;;  %s290_s12 = smov [#allocation3]   ;;  %s218_s16 = scalar_lea.hbm %s358_s0, 128 }
   0x3   :  { %s16_s13 = sshll.u32 %s290_s12, 4  ;;  %p219_p0 = scmp.ne.s32.totalorder %s358_s0, %s218_s16  ;;  %s17_s13 = int_to_ptr.vmem [resolvable:$true] %s16_s13 }
   0x4   :  { %p222_p1 = scmp.lt.u32.totalorder %s218_s16, %s358_s0 }
   0x6   :  { %p224_p2 = pnand %p222_p1, %p219_p0 }
   0x8   :  { %227 = shalt.err (!%p224_p2)
}
   0x9   :  { %s228_s21 = scalar_lea.vmem %s17_s13, 128  ;;  %p233_p4 = scmp.lt.s32.totalorder %s17_s13, %s17_s13 }
   0xa   :  { %p229_p3 = scmp.ne.s32.totalorder %s17_s13, %s228_s21  ;;  %p234_p5 = scmp.lt.s32.totalorder %s228_s21, %s228_s21 }
   0xc   :  { %p235_p6 = por %p234_p5, %p233_p4 }
   0xe   :  { %p236_p7 = pnand %p235_p6, %p229_p3 }
  0x10   :  { %239 = shalt.err (!%p236_p7)
}
  0x11   :  { %s291_s22 = smov 64   ;;  %s292_s23 = smov 4  }
  0x12   :  { %22 = dma.hbm_to_vmem [thread:$0]  %s358_s0, 128, %s17_s13, [#allocation4], %s291_s22, %s291_s22, %s292_s23  }
  0x13   :  { %s293_s26 = smov [#allocation6]   ;;  %s240_s30 = scalar_lea.hbm %s359_s1, 512 }
  0x14   :  { %s28_s27 = sshll.u32 %s293_s26, 4  ;;  %p241_p8 = scmp.ne.s32.totalorder %s359_s1, %s240_s30  ;;  %s29_s27 = int_to_ptr.vmem [resolvable:$true] %s28_s27 }
  0x15   :  { %p244_p9 = scmp.lt.u32.totalorder %s240_s30, %s359_s1 }
  0x17   :  { %p246_p10 = pnand %p244_p9, %p241_p8 }
  0x19   :  { %249 = shalt.err (!%p246_p10)
}
  0x1a   :  { %s250_s8 = scalar_lea.vmem %s29_s27, 512  ;;  %p255_p12 = scmp.lt.s32.totalorder %s29_s27, %s29_s27 }
  0x1b   :  { %p251_p11 = scmp.ne.s32.totalorder %s29_s27, %s250_s8  ;;  %p256_p13 = scmp.lt.s32.totalorder %s250_s8, %s250_s8 }
  0x1d   :  { %p257_p0 = por %p256_p13, %p255_p12 }
  0x1f   :  { %p258_p1 = pnand %p257_p0, %p251_p11 }
  0x21   :  { %261 = shalt.err (!%p258_p1)
}
  0x22   :  { %34 = dma.hbm_to_vmem [thread:$0]  %s359_s1, 512, %s29_s27, [#allocation7], %s291_s22, %s291_s22, %s292_s23  }
  0x23   :  { %284 = dma.done.wait [#allocation4], 128  }
  0x24   :  { %285 = vsyncadd [#allocation4], 4294967168 }
  0x25   :  { %286 = dma.done.wait [#allocation7], 512  }
  0x26   :  { %287 = vsyncadd [#allocation7], 4294966784  ;;  %v294_v0 = vmov 0.0   ;;  %vm295_vm0 = vmmov 0   ;;  %v213_v1 = vld [vmem:[#allocation6] sm:$0xff]   ;;  %v214_v2 = vld [vmem:[#allocation6 + $0x8] sm:$0xff]  }
  0x27   :  { %192 = vmatprep.subr.bf16.mxu0 %v294_v0  ;;  %200 = vmatprep.mubr.msk.bf16.mxu0 %vm295_vm0, %v294_v0  ;;  %v215_v3 = vld [vmem:[#allocation6 + $0x10] sm:$0xff]   ;;  %v216_v4 = vld [vmem:[#allocation6 + $0x18] sm:$0xff]   ;;  %vm91_vm1 = vcmask 523264   ;;  %s296_s11 = smov [#allocation8]  }
  0x28   :  { %193 = vmatpush3.bf16.msra.mxu0 %v213_v1  ;;  %v217_v5 = vld [vmem:[#allocation3] sm:$0xff]   ;;  %s167_s12 = sshll.u32 %s296_s11, 4  ;;  %s168_s12 = int_to_ptr.vmem [resolvable:$true] %s167_s12 }
  0x29   :  { %194 = vmatprep.subr.bf16.mxu0 %v294_v0  ;;  %v186_v6 = vld [vmem:[%s360_s2] ss:$0 sm:$0xff]  ;;  %s262_s13 = scalar_lea.vmem %s168_s12, 256  ;;  %p267_p3 = scmp.lt.s32.totalorder %s168_s12, %s168_s12 }
  0x2a   :  { %p263_p2 = scmp.ne.s32.totalorder %s168_s12, %s262_s13  ;;  %p268_p4 = scmp.lt.s32.totalorder %s262_s13, %s262_s13 }
  0x2c   :  { %195 = vmatpush3.bf16.msra.mxu0 %v214_v2  ;;  %p269_p5 = por %p268_p4, %p267_p3 }
  0x2d   :  { %196 = vmatprep.subr.bf16.mxu0 %v294_v0 }
  0x2e   :  { %p270_p6 = pnand %p269_p5, %p263_p2 }
  0x30   :  { %197 = vmatpush3.bf16.msra.mxu0 %v215_v3 }
  0x31   :  { %198 = vmatprep.subr.bf16.mxu0 %v294_v0 }
  0x34   :  { %199 = vmatpush3.bf16.msra.mxu0 %v216_v4 }
  0x37   :  { %201 = vmatmul.mubr.msk.bf16.vlgmr.msra.gmra.mrb[0].mxu0 %vm91_vm1, %v217_v5 }
 0x10a   :  { %v129_v7 = vpop.f32.mrb[0].mxu0 }
 0x10b   :  { %v152_v8 = vadd.f32 %v186_v6, %v129_v7  ;;  %v202_v9 = vpop.f32.mrb[1].mxu0 }
 0x10c   :  { %v132_v10 = vpop.f32.mrb[2].mxu0 }
 0x10d   :  { %vm154_vm2 = vcmp.ge.f32.partialorder %v152_v8, 0.0  ;;  %v156_v11 = vmul.f32 0.01, %v152_v8  ;;  %v153_v12 = vadd.f32 %v186_v6, %v132_v10  ;;  %v203_v13 = vpop.f32.mrb[3].mxu0 }
 0x10f   :  { %v158_v14 = vsel %vm154_vm2, %v152_v8, %v156_v11  ;;  %vm155_vm3 = vcmp.ge.f32.partialorder %v153_v12, 0.0  ;;  %v157_v15 = vmul.f32 0.01, %v153_v12 }
 0x110   :  { %160 = vst [vmem:[#allocation8] sm:$0xff] %v158_v14 }
 0x111   :  { %v159_v16 = vsel %vm155_vm3, %v153_v12, %v157_v15 }
 0x112   :  { %161 = vst [vmem:[#allocation8 + $0x8] sm:$0xff] %v159_v16 }
 0x113   :  { %273 = shalt.err (!%p270_p6)
}
 0x114   :  { %s274_s15 = scalar_lea.hbm %s361_s3, 256 }
 0x115   :  { %p275_p7 = scmp.ne.s32.totalorder %s361_s3, %s274_s15  ;;  %p278_p8 = scmp.lt.u32.totalorder %s274_s15, %s361_s3 }
 0x117   :  { %p280_p9 = pnand %p278_p8, %p275_p7 }
 0x119   :  { %283 = shalt.err (!%p280_p9)
}
 0x11a   :  { %s297_s20 = smov 128   ;;  %s298_s21 = smov 8  }
 0x11b   :  { %173 = dma.vmem_to_hbm [thread:$0]  %s168_s12, 256, %s361_s3, [#allocation5], %s297_s20, %s297_s20, %s298_s21  }
 0x11c   :  { %288 = dma.done.wait [#allocation5], 256  }
 0x11d   :  { %289 = vsyncadd [#allocation5], 4294967040 }
 0x11e   :  { %177 = vsyncpa [#allocation4], 1 }
 0x11f   :  { %178 = vsyncpa [#allocation7], 1 }
 0x120   :  { %179 = vsyncpa [#allocation5], 1 }

</bundles_post_ra>
